<compile_context>
chip_gen: v5e
topology: v5e:2x2
jax: 0.10.0
libtpu: 0.0.40
codegen_flags: <defaults>
</compile_context>

<pallas_src>
import jax
import jax.numpy as jnp
from jax.experimental import pallas as pl
from jax.experimental.pallas import tpu as pltpu

BN_EPS = 1e-5


def _round_up(x, m):
    return (x + m - 1) // m * m


def _device_vmem_bytes():
    """Physical VMEM per TensorCore; fall back to the smallest current part (v7x)."""
    try:
        return int(pltpu.get_tpu_info().vmem_capacity_bytes)
    except Exception:  # interpret mode / older runtime
        return 64 * 1024 * 1024


def _pick_tile_m(m, k, c_out, in_itemsize, out_itemsize, budget_bytes):
    """Rows per tile: big enough to amortize the ~0.35us/step grid overhead,
    small enough that the resident (double-buffered) weight plus the
    double-buffered input AND output tiles fit inside `budget_bytes`."""
    fixed = 2 * k * c_out * 4 + 4 * c_out * 4                # dbuf'd weight + vectors
    per_row = 2 * (k * in_itemsize + c_out * out_itemsize)   # dbuf'd x + out tile rows
    tm = min(2048, _round_up(m, 8))
    while tm > 8 and fixed + tm * per_row > budget_bytes:
        tm = max(8, _round_up(tm // 2, 8))
    return tm


def _stats_kernel(x_ref, w_ref, stats_ref):
    """Sweep 1: per-tile partial sum and sum-of-squares of y = relu(x) @ W.

    Each grid step owns its own (2, C_out) output block, so the grid axis is
    fully parallel (v7x shards it across both TensorCores) and the partials
    are combined outside the kernel."""
    x = jnp.maximum(x_ref[...], 0.0)                                  # ReLU
    y = jnp.dot(x, w_ref[...], preferred_element_type=jnp.float32)    # (TM, C_out)
    stats_ref[0:1, :] = jnp.sum(y, axis=0, keepdims=True)
    stats_ref[1:2, :] = jnp.sum(y * y, axis=0, keepdims=True)


def _normalize_kernel(x_ref, w_ref, shift_ref, o_ref):
    """Sweep 2: recompute y = relu(x) @ (W * bn_scale), add folded shift, cast."""
    x = jnp.maximum(x_ref[...], 0.0)
    y = jnp.dot(x, w_ref[...], preferred_element_type=jnp.float32)
    o_ref[...] = (y + shift_ref[...]).astype(o_ref.dtype)


def factorized_reduce(x, w1, w2, gamma, beta, *, channels_last=False):
    """x: (N, C_in, H, W) NCHW, H and W even. w1/w2: (C_out//2, C_in, 1, 1).

    Returns BN(concat([conv1(relu(x)), conv2(relu(x)[:,:,1:,1:])], ch)) with
    training-mode batch statistics (matching the PyTorch module).  Set
    channels_last=True to get NHWC and elide the final layout transpose."""
    N, C_in, H, W = x.shape
    assert H % 2 == 0 and W % 2 == 0, "torch.cat requires matching spatial dims"
    Ho, Wo = H // 2, W // 2
    Ch = w1.shape[0]
    C_out = 2 * Ch
    K = 2 * C_in
    M = N * Ho * Wo

    # Follow the network's precision: bf16 stays bf16 (native MXU path on
    # v6e/v7x, halves HBM reads); everything else computes in f32.
    compute_dtype = jnp.bfloat16 if x.dtype == jnp.bfloat16 else jnp.float32
    out_dtype = x.dtype
    in_isz = jnp.dtype(compute_dtype).itemsize
    out_isz = jnp.dtype(out_dtype).itemsize

    # --- Generation-aware tiling / VMEM budget. ---
    vmem_cap = _device_vmem_bytes()
    vmem_limit = min(vmem_cap * 3 // 4, 100 * 1024 * 1024)
    tile_budget = vmem_limit // 2          # headroom for compiler scratch
    TM = _pick_tile_m(M, K, C_out, in_isz, out_isz, tile_budget)
    T = pl.cdiv(M, TM)
    M_pad = T * TM
    grid = (T,)

    # --- Single fused gather: both strided sub-grids stacked along channels,
    # channels-last (M, 2*C_in).  Rows zero-padded to a tile multiple:
    # relu(0) @ W == 0, so padding is invisible to the statistics, and padded
    # output rows are sliced off below (no per-element masking in-kernel).
    x_cat = jnp.concatenate([x[:, :, 0::2, 0::2], x[:, :, 1::2, 1::2]], axis=1)
    x_cat = jnp.transpose(x_cat, (0, 2, 3, 1)).reshape(M, K).astype(compute_dtype)
    if M_pad > M:
        x_cat = jnp.pad(x_cat, ((0, M_pad - M), (0, 0)))

    # Block-diagonal weight: one (K, C_out) matmul yields [conv_1 | conv_2]
    # already concatenated along channels.
    # TODO(synk): for large C_in (>~256) split into two half-matmuls to halve
    # MXU pushes and resident-weight VMEM (only matters once compute-bound).
    w1m = w1.reshape(Ch, C_in).T.astype(jnp.float32)   # (C_in, Ch)
    w2m = w2.reshape(Ch, C_in).T.astype(jnp.float32)
    z = jnp.zeros((C_in, Ch), jnp.float32)
    w_bd = jnp.concatenate(
        [jnp.concatenate([w1m, z], axis=1),
         jnp.concatenate([z, w2m], axis=1)], axis=0)   # (K, C_out) f32

    x_spec = pl.BlockSpec((TM, K), lambda i: (i, 0))
    w_spec = pl.BlockSpec((K, C_out), lambda i: (0, 0))     # VMEM-resident
    vec_spec = pl.BlockSpec((1, C_out), lambda i: (0, 0))   # VMEM-resident
    # TODO(synk): when C_out < 128 this is a lane-masked partial store; a
    # lane-dense (M*C_out/128, 128) output slab would speed up the store side.
    o_spec = pl.BlockSpec((TM, C_out), lambda i: (i, 0))

    flops = 2 * M_pad * K * C_out
    x_bytes = M_pad * K * in_isz
    w_bytes = K * C_out * 4
    out_bytes = M_pad * C_out * out_isz

    # --- Sweep 1: per-tile partial sums (fully parallel grid axis). ---
    stats_parts = pl.pallas_call(
        _stats_kernel,
        out_shape=jax.ShapeDtypeStruct((T, 2, C_out), jnp.float32),
        grid=grid,
        in_specs=[x_spec, w_spec],
        out_specs=pl.BlockSpec((None, 2, C_out), lambda i: (i, 0, 0)),
        compiler_params=pltpu.CompilerParams(
            dimension_semantics=("parallel",),
            vmem_limit_bytes=vmem_limit),
        cost_estimate=pl.CostEstimate(
            flops=flops, transcendentals=0,
            bytes_accessed=x_bytes + w_bytes + T * 2 * C_out * 4),
    )(x_cat, w_bd.astype(compute_dtype))

    # Tiny (C_out,) BN fold in the wrapper (training-mode batch stats, biased
    # variance like PyTorch): out = y * scale + shift, with `scale` pre-folded
    # into the sweep-2 weight so only `+ shift` remains in-kernel.
    # NOTE: E[y^2] - mean^2 in f32 can cancel for extreme M / magnitudes; the
    # clamp prevents NaN.  # TODO(synk): Welford-style merge of tile partials.
    stats = jnp.sum(stats_parts, axis=0)                  # (2, C_out) f32
    mean = stats[0] / M
    var = jnp.maximum(stats[1] / M - mean * mean, 0.0)
    scale = gamma.astype(jnp.float32) * jax.lax.rsqrt(var + BN_EPS)
    shift = (beta.astype(jnp.float32) - mean * scale).reshape(1, C_out)
    w_scaled = (w_bd * scale[None, :]).astype(compute_dtype)

    # --- Sweep 2: recompute y per tile, add folded shift, cast. ---
    out_pad = pl.pallas_call(
        _normalize_kernel,
        out_shape=jax.ShapeDtypeStruct((M_pad, C_out), out_dtype),
        grid=grid,
        in_specs=[x_spec, w_spec, vec_spec],
        out_specs=o_spec,
        compiler_params=pltpu.CompilerParams(
            dimension_semantics=("parallel",),
            vmem_limit_bytes=vmem_limit),
        cost_estimate=pl.CostEstimate(
            flops=flops, transcendentals=0,
            bytes_accessed=x_bytes + w_bytes + out_bytes),
    )(x_cat, w_scaled, shift)

    out_flat = out_pad[:M] if M_pad > M else out_pad
    out_nhwc = out_flat.reshape(N, Ho, Wo, C_out)
    if channels_last:
        return out_nhwc      # consumer accepts NHWC: no layout transpose at all
    # NHWC -> NCHW only to match the PyTorch interface (one extra read+write
    # of the output; pass channels_last=True to elide it).
    return jnp.transpose(out_nhwc, (0, 3, 1, 2))


def _reference(x, w1, w2, gamma, beta):
    """Pure-JAX reference matching the PyTorch forward (training-mode BN)."""
    xr = jnp.maximum(x, 0.0)
    dn = ("NCHW", "OIHW", "NCHW")
    y1 = jax.lax.conv_general_dilated(xr, w1, (2, 2), "VALID", dimension_numbers=dn)
    y2 = jax.lax.conv_general_dilated(xr[:, :, 1:, 1:], w2, (2, 2), "VALID",
                                      dimension_numbers=dn)
    y = jnp.concatenate([y1, y2], axis=1)
    mean = jnp.mean(y, axis=(0, 2, 3), keepdims=True)
    var = jnp.mean((y - mean) ** 2, axis=(0, 2, 3), keepdims=True)
    yhat = (y - mean) / jnp.sqrt(var + BN_EPS)
    return yhat * gamma.reshape(1, -1, 1, 1) + beta.reshape(1, -1, 1, 1)


if __name__ == "__main__":
    # Small deterministic config consistent with the module.
    N, C_in, H, W = 2, 4, 16, 16
    C_out = 8          # must be even
    Ch = C_out // 2

    key = jax.random.PRNGKey(0)
    kx, k1, k2 = jax.random.split(key, 3)

    x = jax.random.normal(kx, (N, C_in, H, W), dtype=jnp.float32)

    # Conv2d default init: kaiming_uniform(a=sqrt(5)) -> U(-1/sqrt(fan_in), 1/sqrt(fan_in))
    bound = 1.0 / (C_in ** 0.5)
    w1 = jax.random.uniform(k1, (Ch, C_in, 1, 1), jnp.float32, -bound, bound)
    w2 = jax.random.uniform(k2, (Ch, C_in, 1, 1), jnp.float32, -bound, bound)

    # BatchNorm2d(affine=True) init: gamma=1, beta=0.
    gamma = jnp.ones((C_out,), jnp.float32)
    beta = jnp.zeros((C_out,), jnp.float32)

    out = factorized_reduce(x, w1, w2, gamma, beta)
    out = jax.block_until_ready(out)

    ref = _reference(x, w1, w2, gamma, beta)
    assert out.shape == (N, C_out, H // 2, W // 2)
    assert jnp.allclose(out, ref, atol=1e-4, rtol=1e-4), \
        f"max err {jnp.max(jnp.abs(out - ref))}"

    print("KERNEL_OK")
</pallas_src>

<mosaic_0001>
module attributes {stable_mosaic.version = 11 : i64} {
  func.func @_stats_kernel(%arg0: i32, %arg1: memref<128x8xf32, #tpu.memory_space<vmem>>, %arg2: memref<8x8xf32, #tpu.memory_space<vmem>>, %arg3: memref<1x2x8xf32, #tpu.memory_space<vmem>>) attributes {dimension_semantics = [#tpu.dimension_semantics<parallel>], iteration_bounds = array<i64: 1>, scalar_prefetch = 0 : i64, scratch_operands = 0 : i64, tpu.core_type = #tpu.core_type<tc>, window_params = [{transform_indices = @transform_0, window_bounds = array<i64: 128, 8>}, {pipeline_mode = #tpu.pipeline_mode<synchronous>, transform_indices = @transform_1, window_bounds = array<i64: 8, 8>}, {transform_indices = @transform_2, window_bounds = array<i64: 1, 2, 8>}]} {
    %c0 = arith.constant 0 : index
    %c0_0 = arith.constant 0 : index
    %0 = vector.load %arg1[%c0, %c0_0] : memref<128x8xf32, #tpu.memory_space<vmem>>, vector<128x8xf32>
    %cst = arith.constant 0.000000e+00 : f32
    %1 = vector.broadcast %cst : f32 to vector<128x8xf32>
    %2 = arith.maximumf %0, %1 : vector<128x8xf32>
    %c0_1 = arith.constant 0 : index
    %c0_2 = arith.constant 0 : index
    %3 = vector.load %arg2[%c0_1, %c0_2] : memref<8x8xf32, #tpu.memory_space<vmem>>, vector<8x8xf32>
    %cst_3 = arith.constant dense<0.000000e+00> : vector<128x8xf32>
    %4 = tpu.matmul %2, %3, %cst_3 {dimension_numbers = #tpu.dot_dimension_numbers<[1], [0], [0], [1], [0, 0, 1, 1], [], []>} : vector<128x8xf32>, vector<8x8xf32>, vector<128x8xf32> -> vector<128x8xf32>
    %cst_4 = arith.constant dense<0.000000e+00> : vector<8xf32>
    %5 = vector.multi_reduction <add>, %4, %cst_4 [0] : vector<128x8xf32> to vector<8xf32>
    %6 = vector.shape_cast %5 : vector<8xf32> to vector<1x8xf32>
    %c0_5 = arith.constant 0 : index
    %c0_6 = arith.constant 0 : index
    %c0_7 = arith.constant 0 : index
    %7 = vector.load %arg3[%c0_5, %c0_6, %c0_7] : memref<1x2x8xf32, #tpu.memory_space<vmem>>, vector<1x1x8xf32>
    %8 = vector.shape_cast %7 : vector<1x1x8xf32> to vector<1x8xf32>
    %9 = vector.shape_cast %6 : vector<1x8xf32> to vector<1x1x8xf32>
    tpu.vector_store %arg3[%c0_5, %c0_6, %c0_7], %9 {strides = array<i32>} : memref<1x2x8xf32, #tpu.memory_space<vmem>>, vector<1x1x8xf32>,
    %10 = arith.mulf %4, %4 : vector<128x8xf32>
    %cst_8 = arith.constant dense<0.000000e+00> : vector<8xf32>
    %11 = vector.multi_reduction <add>, %10, %cst_8 [0] : vector<128x8xf32> to vector<8xf32>
    %12 = vector.shape_cast %11 : vector<8xf32> to vector<1x8xf32>
    %c0_9 = arith.constant 0 : index
    %c1 = arith.constant 1 : index
    %c0_10 = arith.constant 0 : index
    %13 = vector.load %arg3[%c0_9, %c1, %c0_10] : memref<1x2x8xf32, #tpu.memory_space<vmem>>, vector<1x1x8xf32>
    %14 = vector.shape_cast %13 : vector<1x1x8xf32> to vector<1x8xf32>
    %15 = vector.shape_cast %12 : vector<1x8xf32> to vector<1x1x8xf32>
    tpu.vector_store %arg3[%c0_9, %c1, %c0_10], %15 {strides = array<i32>} : memref<1x2x8xf32, #tpu.memory_space<vmem>>, vector<1x1x8xf32>,
    return
  }
  func.func @transform_0(%arg0: i32) -> (i32, i32) {
    %c0_i32 = arith.constant 0 : i32
    %c0_i32_0 = arith.constant 0 : i32
    return %arg0, %c0_i32 : i32, i32
  }
  func.func @transform_1(%arg0: i32) -> (i32, i32) {
    %c0_i32 = arith.constant 0 : i32
    %c0_i32_0 = arith.constant 0 : i32
    %c0_i32_1 = arith.constant 0 : i32
    return %c0_i32, %c0_i32_0 : i32, i32
  }
  func.func @transform_2(%arg0: i32) -> (i32, i32, i32) {
    %c0_i32 = arith.constant 0 : i32
    %c0_i32_0 = arith.constant 0 : i32
    %c0_i32_1 = arith.constant 0 : i32
    return %arg0, %c0_i32, %c0_i32_0 : i32, i32, i32
  }
}

</mosaic_0001>

<bundles_post_ra>
// kernel: tpu_custom_call.1
= control target key start
LH: loop header
LB: loop body
LE: loop exit
PB: predicated region body
PF: predicated region fallthrough
CT: control target
= control target key end

     0   :  { %vm45_vm0 = vcmask 64512   ;;  %s437_s0 = inlined_call_operand.vmem [shape: f32[128,8], index: 0, kind: input, shape index: {}]   ;;  %s438_s1 = inlined_call_operand.vmem [shape: f32[8,8], index: 1, kind: input, shape index: {}]   ;;  %s439_s2 = inlined_call_operand.hbm [shape: f32[1,2,8], index: 2, kind: output, shape index: {}]  }
   0x1   :  { %v44_v0 = vld [vmem:[%s438_s1] sm:$0xff]  ;;  %v13_v9 = vld [vmem:[%s437_s0 + $0x8] sm:$0xff] }
   0x2   :  { %v12_v1 = vld [vmem:[%s437_s0] sm:$0xff]  ;;  %109 = vmatpush.msra.mxu0 %v44_v0  ;;  %284 = vmatpush.msra.mxu1 %v44_v0  ;;  %v17_v10 = vld [vmem:[%s437_s0 + $0x28] sm:$0xff] }
   0x3   :  { %v28_v2 = vmax.f32 %v12_v1, 0.0  ;;  %v16_v3 = vld [vmem:[%s437_s0 + $0x20] sm:$0xff]  ;;  %285 = vmatpush.msra.mxu2 %v44_v0  ;;  %286 = vmatpush.msra.mxu3 %v44_v0  ;;  %v21_v11 = vld [vmem:[%s437_s0 + $0x48] sm:$0xff] }
   0x4   :  { %v20_v4 = vld [vmem:[%s437_s0 + $0x40] sm:$0xff]  ;;  %v32_v5 = vmax.f32 %v16_v3, 0.0  ;;  %v25_v12 = vld [vmem:[%s437_s0 + $0x68] sm:$0xff] }
   0x5   :  { %v36_v6 = vmax.f32 %v20_v4, 0.0  ;;  %v24_v7 = vld [vmem:[%s437_s0 + $0x60] sm:$0xff]  ;;  %268 = vmatmul.msk.f32.vlgmr.msra.gmra.mxu0 %vm45_vm0, %v28_v2 }
   0x6   :  { %v40_v8 = vmax.f32 %v24_v7, 0.0  ;;  %272 = vmatmul.msk.f32.vlgmr.msra.gmra.mxu1 %vm45_vm0, %v32_v5 }
   0x7   :  { %276 = vmatmul.msk.f32.vlgmr.msra.gmra.mxu2 %vm45_vm0, %v36_v6 }
   0x8   :  { %280 = vmatmul.msk.f32.vlgmr.msra.gmra.mxu3 %vm45_vm0, %v40_v8 }
   0x9   :  { %7 = vsyncpa [#allocation3], 0  ;;  %v29_v13 = vmax.f32 %v13_v9, 0.0  ;;  %v33_v14 = vmax.f32 %v17_v10, 0.0  ;;  %v37_v15 = vmax.f32 %v21_v11, 0.0  ;;  %v41_v16 = vmax.f32 %v25_v12, 0.0 }
   0xa   :  { %v14_v17 = vld [vmem:[%s437_s0 + $0x10] sm:$0xff]  ;;  %v15_v25 = vld [vmem:[%s437_s0 + $0x18] sm:$0xff]  ;;  %vm196_vm1 = vcmask 57344   ;;  %s259_s1 = sshll.u32 %s439_s2, 4  ;;  %s260_s1 = int_to_ptr.hbm [resolvable:$true] %s259_s1 }
   0xb   :  { %v18_v18 = vld [vmem:[%s437_s0 + $0x30] sm:$0xff]  ;;  %v30_v21 = vmax.f32 %v14_v17, 0.0  ;;  %v19_v26 = vld [vmem:[%s437_s0 + $0x38] sm:$0xff]  ;;  %v31_v29 = vmax.f32 %v15_v25, 0.0 }
   0xc   :  { %v22_v19 = vld [vmem:[%s437_s0 + $0x50] sm:$0xff]  ;;  %v34_v22 = vmax.f32 %v18_v18, 0.0  ;;  %v23_v27 = vld [vmem:[%s437_s0 + $0x58] sm:$0xff]  ;;  %v35_v30 = vmax.f32 %v19_v26, 0.0 }
   0xd   :  { %269 = vmatmul.msk.f32.gmra.mxu0 %vm45_vm0, %v29_v13  ;;  %v26_v20 = vld [vmem:[%s437_s0 + $0x70] sm:$0xff]  ;;  %v38_v23 = vmax.f32 %v22_v19, 0.0  ;;  %v27_v28 = vld [vmem:[%s437_s0 + $0x78] sm:$0xff]  ;;  %v39_v31 = vmax.f32 %v23_v27, 0.0  ;;  %s314_s0 = smov [#allocation2]  }
   0xe   :  { %273 = vmatmul.msk.f32.gmra.mxu1 %vm45_vm0, %v33_v14  ;;  %v42_v24 = vmax.f32 %v26_v20, 0.0  ;;  %v43_v32 = vmax.f32 %v27_v28, 0.0  ;;  %s257_s14 = sshll.u32 %s314_s0, 4  ;;  %s258_s14 = int_to_ptr.vmem [resolvable:$true] %s257_s14 }
   0xf   :  { %277 = vmatmul.msk.f32.gmra.mxu2 %vm45_vm0, %v37_v15 }
  0x10   :  { %281 = vmatmul.msk.f32.gmra.mxu3 %vm45_vm0, %v41_v16 }
  0x15   :  { %270 = vmatmul.msk.f32.gmra.mxu0 %vm45_vm0, %v30_v21 }
  0x16   :  { %274 = vmatmul.msk.f32.gmra.mxu1 %vm45_vm0, %v34_v22 }
  0x17   :  { %278 = vmatmul.msk.f32.gmra.mxu2 %vm45_vm0, %v38_v23 }
  0x18   :  { %282 = vmatmul.msk.f32.gmra.mxu3 %vm45_vm0, %v42_v24 }
  0x1d   :  { %271 = vmatmul.msk.f32.gmra.mxu0 %vm45_vm0, %v31_v29 }
  0x1e   :  { %275 = vmatmul.msk.f32.gmra.mxu1 %vm45_vm0, %v35_v30 }
  0x1f   :  { %279 = vmatmul.msk.f32.gmra.mxu2 %vm45_vm0, %v39_v31 }
  0x20   :  { %283 = vmatmul.msk.f32.gmra.mxu3 %vm45_vm0, %v43_v32 }
  0x82   :  { %v111_v33 = vpop.f32.mrf.mxu0 }
  0x83   :  { %v123_v34 = vpop.f32.mrf.mxu1  ;;  %v198_v43 = vmul.f32 %v111_v33, %v111_v33  ;;  %v159_v46 = vsel %vm45_vm0, %v111_v33, 0.0 }
  0x84   :  { %v202_v57 = vmul.f32 %v123_v34, %v123_v34  ;;  %v166_v63 = vsel %vm45_vm0, %v123_v34, 0.0 }
  0x85   :  { %v214_v51 = vsel %vm45_vm0, %v198_v43, 0.0 }
  0x86   :  { %v221_v4 = vsel %vm45_vm0, %v202_v57, 0.0 }
  0x8a   :  { %v135_v35 = vpop.f32.mrf.mxu2  ;;  %v114_v36 = vpop.f32.mrf.mxu0 }
  0x8b   :  { %v126_v37 = vpop.f32.mrf.mxu1  ;;  %v397_v38 = vpop.f32.mrf.mxu3  ;;  %v199_v41 = vmul.f32 %v114_v36, %v114_v36  ;;  %v160_v44 = vsel %vm45_vm0, %v114_v36, 0.0  ;;  %v206_v16 = vmul.f32 %v135_v35, %v135_v35  ;;  %v174_v22 = vsel %vm45_vm0, %v135_v35, 0.0 }
  0x8c   :  { %v161_v49 = vadd.f32 %v160_v44, %v159_v46  ;;  %v203_v0 = vmul.f32 %v126_v37, %v126_v37  ;;  %v168_v5 = vsel %vm45_vm0, %v126_v37, 0.0  ;;  %v210_v35 = vmul.f32 %v397_v38, %v397_v38 }
  0x8d   :  { %v215_v47 = vsel %vm45_vm0, %v199_v41, 0.0  ;;  %v229_v26 = vsel %vm45_vm0, %v206_v16, 0.0  ;;  %v182_v44 = vsel %vm45_vm0, %v397_v38, 0.0 }
  0x8e   :  { %v216_v53 = vadd.f32 %v215_v47, %v214_v51  ;;  %v223_v10 = vsel %vm45_vm0, %v203_v0, 0.0 }
  0x92   :  { %v138_v39 = vpop.f32.mrf.mxu2  ;;  %v117_v40 = vpop.f32.mrf.mxu0 }
  0x93   :  { %v129_v42 = vpop.f32.mrf.mxu1  ;;  %v200_v45 = vmul.f32 %v117_v40, %v117_v40  ;;  %v162_v48 = vsel %vm45_vm0, %v117_v40, 0.0  ;;  %v150_v50 = vpop.f32.mrf.mxu3  ;;  %v207_v23 = vmul.f32 %v138_v39, %v138_v39  ;;  %v176_v27 = vsel %vm45_vm0, %v138_v39, 0.0 }
  0x94   :  { %v163_v54 = vadd.f32 %v162_v48, %v161_v49  ;;  %v204_v6 = vmul.f32 %v129_v42, %v129_v42  ;;  %v170_v11 = vsel %vm45_vm0, %v129_v42, 0.0  ;;  %v237_v48 = vsel %vm45_vm0, %v210_v35, 0.0 }
  0x95   :  { %v217_v52 = vsel %vm45_vm0, %v200_v45, 0.0  ;;  %v231_v32 = vsel %vm45_vm0, %v207_v23, 0.0  ;;  %v211_v45 = vmul.f32 %v150_v50, %v150_v50  ;;  %v184_v49 = vsel %vm45_vm0, %v150_v50, 0.0 }
  0x96   :  { %v218_v60 = vadd.f32 %v217_v52, %v216_v53  ;;  %v225_v17 = vsel %vm45_vm0, %v204_v6, 0.0 }
  0x9a   :  { %v120_v55 = vpop.f32.mrf.mxu0  ;;  %v141_v56 = vpop.f32.mrf.mxu2 }
  0x9b   :  { %v164_v58 = vsel %vm45_vm0, %v120_v55, 0.0  ;;  %v201_v59 = vmul.f32 %v120_v55, %v120_v55  ;;  %v132_v62 = vpop.f32.mrf.mxu1  ;;  %v153_v15 = vpop.f32.mrf.mxu3  ;;  %v208_v28 = vmul.f32 %v141_v56, %v141_v56  ;;  %v178_v33 = vsel %vm45_vm0, %v141_v56, 0.0 }
  0x9c   :  { %v165_v61 = vadd.f32 %v164_v58, %v163_v54  ;;  %v205_v7 = vmul.f32 %v132_v62, %v132_v62  ;;  %v172_v12 = vsel %vm45_vm0, %v132_v62, 0.0  ;;  %v212_v51 = vmul.f32 %v153_v15, %v153_v15 }
  0x9d   :  { %v219_v1 = vsel %vm45_vm0, %v201_v59, 0.0  ;;  %v233_v40 = vsel %vm45_vm0, %v208_v28, 0.0  ;;  %v239_v55 = vsel %vm45_vm0, %v211_v45, 0.0  ;;  %v186_v56 = vsel %vm45_vm0, %v153_v15, 0.0 }
  0x9e   :  { %v167_v2 = vadd.f32 %v166_v63, %v165_v61  ;;  %v220_v3 = vadd.f32 %v219_v1, %v218_v60  ;;  %v227_v18 = vsel %vm45_vm0, %v205_v7, 0.0  ;;  %v241_v38 = vsel %vm45_vm0, %v212_v51, 0.0 }
  0xa0   :  { %v222_v8 = vadd.f32 %v221_v4, %v220_v3  ;;  %v169_v9 = vadd.f32 %v168_v5, %v167_v2 }
  0xa2   :  { %v171_v13 = vadd.f32 %v170_v11, %v169_v9  ;;  %v224_v14 = vadd.f32 %v223_v10, %v222_v8  ;;  %v144_v21 = vpop.f32.mrf.mxu2 }
  0xa3   :  { %v209_v29 = vmul.f32 %v144_v21, %v144_v21  ;;  %v180_v34 = vsel %vm45_vm0, %v144_v21, 0.0  ;;  %v156_v43 = vpop.f32.mrf.mxu3 }
  0xa4   :  { %v226_v19 = vadd.f32 %v225_v17, %v224_v14  ;;  %v173_v20 = vadd.f32 %v172_v12, %v171_v13  ;;  %v213_v52 = vmul.f32 %v156_v43, %v156_v43  ;;  %v188_v57 = vsel %vm45_vm0, %v156_v43, 0.0 }
  0xa5   :  { %v235_v41 = vsel %vm45_vm0, %v209_v29, 0.0 }
  0xa6   :  { %v175_v24 = vadd.f32 %v174_v22, %v173_v20  ;;  %v228_v25 = vadd.f32 %v227_v18, %v226_v19  ;;  %v243_v60 = vsel %vm45_vm0, %v213_v52, 0.0 }
  0xa8   :  { %v230_v30 = vadd.f32 %v229_v26, %v228_v25  ;;  %v177_v31 = vadd.f32 %v176_v27, %v175_v24 }
  0xaa   :  { %v179_v36 = vadd.f32 %v178_v33, %v177_v31  ;;  %v232_v37 = vadd.f32 %v231_v32, %v230_v30 }
  0xac   :  { %v234_v39 = vadd.f32 %v233_v40, %v232_v37  ;;  %v181_v42 = vadd.f32 %v180_v34, %v179_v36 }
  0xae   :  { %v183_v46 = vadd.f32 %v182_v44, %v181_v42  ;;  %v236_v47 = vadd.f32 %v235_v41, %v234_v39 }
  0xb0   :  { %v238_v53 = vadd.f32 %v237_v48, %v236_v47  ;;  %v185_v54 = vadd.f32 %v184_v49, %v183_v46 }
  0xb2   :  { %v187_v58 = vadd.f32 %v186_v56, %v185_v54  ;;  %v240_v59 = vadd.f32 %v239_v55, %v238_v53 }
  0xb4   :  { %v242_v61 = vadd.f32 %v241_v38, %v240_v59  ;;  %v189_v62 = vadd.f32 %v188_v57, %v187_v58 }
  0xb6   :  { %v190_v63 = vrot.slane %v189_v62, 4  ;;  %v244_v50 = vadd.f32 %v243_v60, %v242_v61 }
  0xb8   :  { %v191_v0 = vadd.f32 %v190_v63, %v189_v62  ;;  %v245_v1 = vrot.slane %v244_v50, 4 }
  0xba   :  { %v192_v2 = vrot.slane %v191_v0, 2  ;;  %v246_v3 = vadd.f32 %v245_v1, %v244_v50 }
  0xbc   :  { %v193_v4 = vadd.f32 %v192_v2, %v191_v0  ;;  %v247_v5 = vrot.slane %v246_v3, 2 }
  0xbe   :  { %v194_v6 = vrot.slane %v193_v4, 1  ;;  %v248_v7 = vadd.f32 %v247_v5, %v246_v3 }
  0xc0   :  { %v195_v8 = vadd.f32 %v194_v6, %v193_v4  ;;  %v249_v9 = vrot.slane %v248_v7, 1 }
  0xc2   :  { %197 = vst.msk [vmem:[#allocation2] sm:$0x1] %vm196_vm1, %v195_v8  ;;  %v250_v10 = vadd.f32 %v249_v9, %v248_v7 }
  0xc4   :  { %251 = vst.msk [vmem:[#allocation2 + $0x1] sm:$0x1] %vm196_vm1, %v250_v10 }
  0xc5   :  { %262 = dma.vmem_to_hbm [thread:$0]  %s258_s14, 32, %s260_s1, [#allocation3]  }
  0xc6   :  { %312 = dma.done.wait [#allocation3], 32  }
  0xc7   :  { %313 = vsyncadd [#allocation3], 4294967264 }
  0xc8   :  { %267 = vsyncpa [#allocation3], 1 }

</bundles_post_ra>
